<compile_context>
chip_gen: v7x
topology: tpu7x:2x2x1
jax: 0.10.0
libtpu: 0.0.40
codegen_flags: <defaults>
</compile_context>

<pallas_src>
import math
import functools

import jax
import jax.numpy as jnp
from jax import lax
from jax.experimental import pallas as pl
from jax.experimental.pallas import tpu as pltpu


def _layer_norm(x, gamma, beta, eps=1e-5):
    mu = jnp.mean(x, axis=-1, keepdims=True)
    var = jnp.mean(jnp.square(x - mu), axis=-1, keepdims=True)
    return (x - mu) * lax.rsqrt(var + eps) * gamma + beta


def _erf_poly(x):
    # Abramowitz & Stegun 7.1.26, max abs error ~1.5e-7 in f32.
    a1, a2, a3, a4, a5 = (0.254829592, -0.284496736, 1.421413741,
                          -1.453152027, 1.061405429)
    p = 0.3275911
    sgn = jnp.sign(x)
    ax = jnp.abs(x)
    t = 1.0 / (1.0 + p * ax)
    poly = ((((a5 * t + a4) * t + a3) * t + a2) * t + a1) * t
    return sgn * (1.0 - poly * jnp.exp(-ax * ax))


def _gelu_exact(x):
    # 0.5 * x * (1 + erf(x / sqrt(2)))  (F.gelu default, non-tanh)
    return 0.5 * x * (1.0 + _erf_poly(x * 0.7071067811865476))


# --------------------- kernel 1: K/V projection (once per batch) -------------

def kv_proj_kernel(x_ref, wk_ref, bk_ref, wv_ref, bv_ref, k_out_ref, v_out_ref):
    x = x_ref[0].astype(jnp.bfloat16)                       # (TS, D)
    k = jnp.dot(x, wk_ref[...], preferred_element_type=jnp.float32) + bk_ref[...]
    v = jnp.dot(x, wv_ref[...], preferred_element_type=jnp.float32) + bv_ref[...]
    k_out_ref[0] = k.astype(jnp.bfloat16)                   # (TS, G*d_k)
    v_out_ref[0] = v.astype(jnp.bfloat16)                   # (TS, G*d_v)


# --------------------- kernel 2: fused attention + FFN + 2x LayerNorm --------

def encoder_block_kernel(n_heads, n_groups, d_q, d_v, scale,
                         xq_ref, k_ref, v_ref, bias_ref,
                         wq_ref, bq_ref, wo_ref, bo_ref,
                         w1_ref, b1_ref, w2_ref, b2_ref,
                         g1_ref, be1_ref, g2_ref, be2_ref,
                         out_ref):
    # One grid step == one (batch element, query tile).
    xq = xq_ref[0]            # (TQ, D)        f32  residual path stays f32
    k_all = k_ref[0]          # (S, G*d_k)     bf16 precomputed K projections
    v_all = v_ref[0]          # (S, G*d_v)     bf16 precomputed V projections
    bias = bias_ref[0]        # (1, S)         f32  additive key mask (0 / -1e30)

    hpg = n_heads // n_groups

    # Lane-dense fused Q projection; fold 1/sqrt(d_q) into Q once (f32, before
    # the bf16 cast) so the (TQ, S) score path has no scale multiply.
    q_all = jnp.dot(xq.astype(jnp.bfloat16), wq_ref[...],
                    preferred_element_type=jnp.float32) + bq_ref[...]
    q_all = (q_all * scale).astype(jnp.bfloat16)            # (TQ, H*d_q)

    contract_last = (((1,), (1,)), ((), ()))   # q @ k^T without an XLU transpose
    heads = []
    for g in range(n_groups):
        k_g = k_all[:, g * d_q:(g + 1) * d_q]                # d_k == d_q here
        v_g = v_all[:, g * d_v:(g + 1) * d_v]
        for i in range(hpg):
            h = g * hpg + i                                  # group-major head order
            q_h = q_all[:, h * d_q:(h + 1) * d_q]
            s = lax.dot_general(q_h, k_g, contract_last,
                                preferred_element_type=jnp.float32)   # (TQ, S)
            s = s + bias                                     # mask add in f32
            s_max = jnp.max(s, axis=-1, keepdims=True)
            e = jnp.exp(s - s_max)                           # f32 exp (v5e-safe)
            denom = jnp.sum(e, axis=-1, keepdims=True)
            # Deferred normalisation: scale the (TQ, d_v) PV result instead of
            # the (TQ, S) probability matrix (mathematically identical).
            head = jnp.dot(e.astype(jnp.bfloat16), v_g,
                           preferred_element_type=jnp.float32)         # (TQ, d_v)
            heads.append(head * pl.reciprocal(denom, approx=True))

    # One lane-dense, D-deep output projection instead of H shallow dots.
    concat = jnp.concatenate(heads, axis=-1).astype(jnp.bfloat16)       # (TQ, H*d_v)
    attn = jnp.dot(concat, wo_ref[...],
                   preferred_element_type=jnp.float32) + bo_ref[...]

    h1 = _layer_norm(xq + attn, g1_ref[...], be1_ref[...])

    ff = jnp.dot(h1.astype(jnp.bfloat16), w1_ref[...],
                 preferred_element_type=jnp.float32) + b1_ref[...]
    ff = _gelu_exact(ff)                                     # exact (erf) gelu
    ff = jnp.dot(ff.astype(jnp.bfloat16), w2_ref[...],
                 preferred_element_type=jnp.float32) + b2_ref[...]

    out_ref[0] = _layer_norm(h1 + ff, g2_ref[...], be2_ref[...])


# ----------------------------- wrapper ---------------------------------------

def _const_spec(a):
    """Full-array, single-buffered spec for a constant weight (block index
    never changes, so double-buffering would only double resident VMEM)."""
    n = a.ndim
    idx = lambda b, q, _n=n: (0,) * _n
    try:
        return pl.BlockSpec(a.shape, idx, pipeline_mode=pl.Buffered(1))
    except TypeError:   # older jax without pipeline_mode kwarg
        return pl.BlockSpec(a.shape, idx)


def _pick_tile(S, max_t=256):
    if S <= max_t:
        return S
    best = None
    for t in range(8, min(max_t, S) + 1, 8):
        if S % t == 0:
            best = t
    if best is not None:
        return best
    # TODO(synk): no 8-aligned divisor <= max_t; fall back to full-S tile
    # (VMEM hazard for very long prime-ish sequence lengths).
    return S


def encoder_block(x, params, attn_mask=None, *, n_heads, n_groups, max_q_tile=256):
    B, S, D = x.shape
    p = params
    H, _, d_q = p["wq"].shape
    G, _, d_k = p["wk"].shape
    d_v = p["wv"].shape[-1]
    d_ff = p["w1"].shape[-1]
    assert H == n_heads and G == n_groups and d_k == d_q
    assert n_heads % n_groups == 0

    wdt = jnp.bfloat16   # MXU input dtype (f32 accumulation in the kernels)

    # Fuse per-head / per-group projection weights into lane-dense matrices.
    wq_f = jnp.transpose(p["wq"], (1, 0, 2)).reshape(D, H * d_q).astype(wdt)
    wk_f = jnp.transpose(p["wk"], (1, 0, 2)).reshape(D, G * d_k).astype(wdt)
    wv_f = jnp.transpose(p["wv"], (1, 0, 2)).reshape(D, G * d_v).astype(wdt)
    bq_f = p["bq"].reshape(1, H * d_q).astype(jnp.float32)
    bk_f = p["bk"].reshape(1, G * d_k).astype(jnp.float32)
    bv_f = p["bv"].reshape(1, G * d_v).astype(jnp.float32)
    wo = p["wo"].astype(wdt)
    w1 = p["w1"].astype(wdt)
    w2 = p["w2"].astype(wdt)
    bo = p["bo"].astype(jnp.float32)
    b1 = p["b1"].astype(jnp.float32)
    b2 = p["b2"].astype(jnp.float32)
    g1, be1, g2, be2 = (p[k].astype(jnp.float32) for k in ("g1", "be1", "g2", "be2"))

    x = x.astype(jnp.float32)

    if attn_mask is None:
        bias = jnp.zeros((B, 1, S), jnp.float32)
    else:
        # NOTE: a fully-masked query row degenerates to a uniform distribution
        # over keys (not NaN); acceptable for key-padding masks.
        bias = jnp.where(attn_mask, 0.0, -1e30).astype(jnp.float32).reshape(B, 1, S)

    TS = _pick_tile(S, max_q_tile)     # shared seq / query tile
    ns = S // TS

    # ---- pass 1: K/V projections once per (batch, seq tile) -----------------
    kv_weights = [wk_f, bk_f, wv_f, bv_f]
    k_all, v_all = pl.pallas_call(
        kv_proj_kernel,
        out_shape=(jax.ShapeDtypeStruct((B, S, G * d_k), jnp.bfloat16),
                   jax.ShapeDtypeStruct((B, S, G * d_v), jnp.bfloat16)),
        grid_spec=pltpu.PrefetchScalarGridSpec(
            num_scalar_prefetch=0,
            grid=(B, ns),
            in_specs=[pl.BlockSpec((1, TS, D), lambda b, s: (b, s, 0))]
                     + [_const_spec(w) for w in kv_weights],
            out_specs=(pl.BlockSpec((1, TS, G * d_k), lambda b, s: (b, s, 0)),
                       pl.BlockSpec((1, TS, G * d_v), lambda b, s: (b, s, 0))),
        ),
        compiler_params=pltpu.CompilerParams(
            dimension_semantics=("parallel", "parallel")),
    )(x, *kv_weights)

    # ---- pass 2: fused attention + FFN + 2x LayerNorm ------------------------
    weights = [wq_f, bq_f, wo, bo, w1, b1, w2, b2, g1, be1, g2, be2]

    # VMEM budget computed from actual buffer sizes (+50% headroom), clamped to
    # [32 MiB, 100 MiB] so large configs stay legal on v7x yet use v6e headroom.
    weight_bytes = ((wq_f.size + wo.size + w1.size + w2.size) * 2
                    + (bq_f.size + bo.size + b1.size + b2.size
                       + g1.size + be1.size + g2.size + be2.size) * 4)
    io_bytes = 2 * (TS * D * 4                                  # xq tile
                    + S * G * d_k * 2 + S * G * d_v * 2         # K / V
                    + S * 4                                     # mask bias
                    + TS * D * 4)                               # output tile
    act_bytes = (2 * TS * S * 4                                 # scores + exp
                 + TS * d_ff * 6                                # FFN intermediate
                 + TS * H * d_q * 6 + TS * D * 16)              # q_all, heads, LN temps
    vmem_limit = int(min(100 * 2 ** 20,
                         max(32 * 2 ** 20,
                             (weight_bytes + io_bytes + act_bytes) * 3 // 2)))

    kernel = functools.partial(encoder_block_kernel, n_heads, n_groups, d_q, d_v,
                               1.0 / math.sqrt(d_q))

    return pl.pallas_call(
        kernel,
        out_shape=jax.ShapeDtypeStruct((B, S, D), jnp.float32),
        grid_spec=pltpu.PrefetchScalarGridSpec(
            num_scalar_prefetch=0,
            grid=(B, ns),
            in_specs=[pl.BlockSpec((1, TS, D), lambda b, q: (b, q, 0)),          # query tile
                      pl.BlockSpec((1, S, G * d_k), lambda b, q: (b, 0, 0)),     # K (bf16)
                      pl.BlockSpec((1, S, G * d_v), lambda b, q: (b, 0, 0)),     # V (bf16)
                      pl.BlockSpec((1, 1, S), lambda b, q: (b, 0, 0))]           # key mask
                     + [_const_spec(w) for w in weights],
            out_specs=pl.BlockSpec((1, TS, D), lambda b, q: (b, q, 0)),
        ),
        compiler_params=pltpu.CompilerParams(
            dimension_semantics=("parallel", "parallel"),
            vmem_limit_bytes=vmem_limit),
    )(x, k_all, v_all, bias, *weights)


# ----------------------------- reference (pure JAX) ---------------------------

def encoder_block_ref(x, params, attn_mask, *, n_heads, n_groups,
                      mm_dtype=jnp.float32):
    """Pure-JAX reference. mm_dtype controls the matmul-input precision so the
    same function serves as a strict f32 reference and a matched-precision
    (bf16-MXU) reference."""
    p = params
    B, S, D = x.shape
    hpg = n_heads // n_groups
    d_q = p["wq"].shape[-1]
    scale = 1.0 / math.sqrt(d_q)
    if attn_mask is None:
        bias = jnp.zeros((B, 1, S), jnp.float32)
    else:
        bias = jnp.where(attn_mask, 0.0, -1e30).astype(jnp.float32).reshape(B, 1, S)

    def mm(a, b, eq):
        return jnp.einsum(eq, a.astype(mm_dtype), b.astype(mm_dtype),
                          preferred_element_type=jnp.float32)

    outs = []
    for g in range(n_groups):
        k = mm(x, p["wk"][g], "bsd,de->bse") + p["bk"][g]
        v = mm(x, p["wv"][g], "bsd,de->bse") + p["bv"][g]
        for i in range(hpg):
            h = g * hpg + i
            q = mm(x, p["wq"][h], "bsd,de->bse") + p["bq"][h]
            s = mm(q, k, "bse,bte->bst") * scale + bias
            pr = jax.nn.softmax(s, axis=-1)
            outs.append(mm(pr, v, "bst,bte->bse"))
    attn = mm(jnp.concatenate(outs, axis=-1), p["wo"], "bsd,de->bse") + p["bo"]
    h1 = _layer_norm(x + attn, p["g1"], p["be1"])
    ff = mm(jax.nn.gelu(mm(h1, p["w1"], "bsd,de->bse") + p["b1"],
                        approximate=False), p["w2"], "bsd,de->bse") + p["b2"]
    return _layer_norm(h1 + ff, p["g2"], p["be2"])


# ----------------------------- params / main ----------------------------------

def make_params(key, d_model, n_heads, n_groups, d_v=None, d_ff=None):
    d_q = d_model // n_heads
    d_k = d_q
    d_v = d_v or d_q
    d_ff = d_ff or 4 * d_model
    ks = jax.random.split(key, 12)
    s = 0.05
    params = {
        "wq": s * jax.random.normal(ks[0], (n_heads, d_model, d_q), jnp.float32),
        "bq": s * jax.random.normal(ks[1], (n_heads, 1, d_q), jnp.float32),
        "wk": s * jax.random.normal(ks[2], (n_groups, d_model, d_k), jnp.float32),
        "bk": s * jax.random.normal(ks[3], (n_groups, 1, d_k), jnp.float32),
        "wv": s * jax.random.normal(ks[4], (n_groups, d_model, d_v), jnp.float32),
        "bv": s * jax.random.normal(ks[5], (n_groups, 1, d_v), jnp.float32),
        "wo": s * jax.random.normal(ks[6], (n_heads * d_v, d_model), jnp.float32),
        "bo": s * jax.random.normal(ks[7], (1, d_model), jnp.float32),
        "w1": s * jax.random.normal(ks[8], (d_model, d_ff), jnp.float32),
        "b1": s * jax.random.normal(ks[9], (1, d_ff), jnp.float32),
        "w2": s * jax.random.normal(ks[10], (d_ff, d_model), jnp.float32),
        "b2": s * jax.random.normal(ks[11], (1, d_model), jnp.float32),
        "g1": jnp.ones((1, d_model), jnp.float32),
        "be1": jnp.zeros((1, d_model), jnp.float32),
        "g2": jnp.ones((1, d_model), jnp.float32),
        "be2": jnp.zeros((1, d_model), jnp.float32),
    }
    return params


if __name__ == "__main__":
    B, S, D = 2, 8, 32
    n_heads, n_groups = 4, 2            # heads_per_group = 2 (grouped attention)

    key = jax.random.PRNGKey(0)
    k_x, k_p = jax.random.split(key)
    x = jax.random.normal(k_x, (B, S, D), jnp.float32)
    params = make_params(k_p, D, n_heads, n_groups)

    # boolean key mask (B, S): True = attend (second batch masks last 2 tokens)
    attn_mask = jnp.ones((B, S), dtype=bool).at[1, -2:].set(False)

    out = encoder_block(x, params, attn_mask, n_heads=n_heads, n_groups=n_groups)
    out = jax.block_until_ready(out)

    # Matched-precision reference (bf16 MXU inputs, f32 accumulate/elementwise).
    ref_bf16 = encoder_block_ref(x, params, attn_mask, n_heads=n_heads,
                                 n_groups=n_groups, mm_dtype=jnp.bfloat16)
    # Pure f32 reference (original module semantics).
    ref_f32 = encoder_block_ref(x, params, attn_mask, n_heads=n_heads,
                                n_groups=n_groups, mm_dtype=jnp.float32)

    if not bool(jnp.allclose(out, ref_bf16, atol=1e-2, rtol=1e-2)):
        raise AssertionError("Pallas kernel mismatch vs. matched-precision reference")
    if not bool(jnp.allclose(out, ref_f32, atol=3e-2, rtol=3e-2)):
        raise AssertionError("Pallas kernel drifted too far from f32 reference")

    print("KERNEL_OK")
</pallas_src>

<mosaic_0001>
module attributes {stable_mosaic.version = 11 : i64} {
  func.func @kv_proj_kernel(%arg0: i32, %arg1: i32, %arg2: memref<1x8x32xf32, #tpu.memory_space<vmem>>, %arg3: memref<32x16xbf16, #tpu.memory_space<vmem>>, %arg4: memref<1x16xf32, #tpu.memory_space<vmem>>, %arg5: memref<32x16xbf16, #tpu.memory_space<vmem>>, %arg6: memref<1x16xf32, #tpu.memory_space<vmem>>, %arg7: memref<1x8x16xbf16, #tpu.memory_space<vmem>>, %arg8: memref<1x8x16xbf16, #tpu.memory_space<vmem>>) attributes {dimension_semantics = [#tpu.dimension_semantics<parallel>, #tpu.dimension_semantics<parallel>], iteration_bounds = array<i64: 2, 1>, scalar_prefetch = 0 : i64, scratch_operands = 0 : i64, tpu.core_type = #tpu.core_type<tc>, window_params = [{transform_indices = @transform_0, window_bounds = array<i64: 1, 8, 32>}, {pipeline_mode = #tpu.pipeline_mode<synchronous>, transform_indices = @transform_1, window_bounds = array<i64: 32, 16>}, {pipeline_mode = #tpu.pipeline_mode<synchronous>, transform_indices = @transform_2, window_bounds = array<i64: 1, 16>}, {pipeline_mode = #tpu.pipeline_mode<synchronous>, transform_indices = @transform_3, window_bounds = array<i64: 32, 16>}, {pipeline_mode = #tpu.pipeline_mode<synchronous>, transform_indices = @transform_4, window_bounds = array<i64: 1, 16>}, {transform_indices = @transform_5, window_bounds = array<i64: 1, 8, 16>}, {transform_indices = @transform_6, window_bounds = array<i64: 1, 8, 16>}]} {
    %c0 = arith.constant 0 : index
    %c0_0 = arith.constant 0 : index
    %c0_1 = arith.constant 0 : index
    %0 = vector.load %arg2[%c0, %c0_0, %c0_1] : memref<1x8x32xf32, #tpu.memory_space<vmem>>, vector<1x8x32xf32>
    %1 = vector.shape_cast %0 : vector<1x8x32xf32> to vector<8x32xf32>
    %2 = arith.truncf %1 : vector<8x32xf32> to vector<8x32xbf16>
    %c0_2 = arith.constant 0 : index
    %c0_3 = arith.constant 0 : index
    %3 = vector.load %arg3[%c0_2, %c0_3] : memref<32x16xbf16, #tpu.memory_space<vmem>>, vector<32x16xbf16>
    %cst = arith.constant dense<0.000000e+00> : vector<8x16xf32>
    %4 = tpu.matmul %2, %3, %cst {dimension_numbers = #tpu.dot_dimension_numbers<[1], [0], [0], [1], [0, 0, 1, 1], [], []>} : vector<8x32xbf16>, vector<32x16xbf16>, vector<8x16xf32> -> vector<8x16xf32>
    %c0_4 = arith.constant 0 : index
    %c0_5 = arith.constant 0 : index
    %5 = vector.load %arg4[%c0_4, %c0_5] : memref<1x16xf32, #tpu.memory_space<vmem>>, vector<1x16xf32>
    %6 = vector.broadcast %5 : vector<1x16xf32> to vector<8x16xf32>
    %7 = arith.addf %4, %6 : vector<8x16xf32>
    %c0_6 = arith.constant 0 : index
    %c0_7 = arith.constant 0 : index
    %8 = vector.load %arg5[%c0_6, %c0_7] : memref<32x16xbf16, #tpu.memory_space<vmem>>, vector<32x16xbf16>
    %cst_8 = arith.constant dense<0.000000e+00> : vector<8x16xf32>
    %9 = tpu.matmul %2, %8, %cst_8 {dimension_numbers = #tpu.dot_dimension_numbers<[1], [0], [0], [1], [0, 0, 1, 1], [], []>} : vector<8x32xbf16>, vector<32x16xbf16>, vector<8x16xf32> -> vector<8x16xf32>
    %c0_9 = arith.constant 0 : index
    %c0_10 = arith.constant 0 : index
    %10 = vector.load %arg6[%c0_9, %c0_10] : memref<1x16xf32, #tpu.memory_space<vmem>>, vector<1x16xf32>
    %11 = vector.broadcast %10 : vector<1x16xf32> to vector<8x16xf32>
    %12 = arith.addf %9, %11 : vector<8x16xf32>
    %13 = arith.truncf %7 : vector<8x16xf32> to vector<8x16xbf16>
    %c0_11 = arith.constant 0 : index
    %c0_12 = arith.constant 0 : index
    %c0_13 = arith.constant 0 : index
    %14 = vector.load %arg7[%c0_11, %c0_12, %c0_13] : memref<1x8x16xbf16, #tpu.memory_space<vmem>>, vector<1x8x16xbf16>
    %15 = vector.shape_cast %14 : vector<1x8x16xbf16> to vector<8x16xbf16>
    %16 = vector.shape_cast %13 : vector<8x16xbf16> to vector<1x8x16xbf16>
    tpu.vector_store %arg7[%c0_11, %c0_12, %c0_13], %16 {strides = array<i32>} : memref<1x8x16xbf16, #tpu.memory_space<vmem>>, vector<1x8x16xbf16>,
    %17 = arith.truncf %12 : vector<8x16xf32> to vector<8x16xbf16>
    %c0_14 = arith.constant 0 : index
    %c0_15 = arith.constant 0 : index
    %c0_16 = arith.constant 0 : index
    %18 = vector.load %arg8[%c0_14, %c0_15, %c0_16] : memref<1x8x16xbf16, #tpu.memory_space<vmem>>, vector<1x8x16xbf16>
    %19 = vector.shape_cast %18 : vector<1x8x16xbf16> to vector<8x16xbf16>
    %20 = vector.shape_cast %17 : vector<8x16xbf16> to vector<1x8x16xbf16>
    tpu.vector_store %arg8[%c0_14, %c0_15, %c0_16], %20 {strides = array<i32>} : memref<1x8x16xbf16, #tpu.memory_space<vmem>>, vector<1x8x16xbf16>,
    return
  }
  func.func @transform_0(%arg0: i32, %arg1: i32) -> (i32, i32, i32) {
    %c0_i32 = arith.constant 0 : i32
    %c0_i32_0 = arith.constant 0 : i32
    return %arg0, %arg1, %c0_i32 : i32, i32, i32
  }
  func.func @transform_1(%arg0: i32, %arg1: i32) -> (i32, i32) {
    %c0_i32 = arith.constant 0 : i32
    %c0_i32_0 = arith.constant 0 : i32
    %c0_i32_1 = arith.constant 0 : i32
    return %c0_i32, %c0_i32_0 : i32, i32
  }
  func.func @transform_2(%arg0: i32, %arg1: i32) -> (i32, i32) {
    %c0_i32 = arith.constant 0 : i32
    %c0_i32_0 = arith.constant 0 : i32
    %c0_i32_1 = arith.constant 0 : i32
    return %c0_i32, %c0_i32_0 : i32, i32
  }
  func.func @transform_3(%arg0: i32, %arg1: i32) -> (i32, i32) {
    %c0_i32 = arith.constant 0 : i32
    %c0_i32_0 = arith.constant 0 : i32
    %c0_i32_1 = arith.constant 0 : i32
    return %c0_i32, %c0_i32_0 : i32, i32
  }
  func.func @transform_4(%arg0: i32, %arg1: i32) -> (i32, i32) {
    %c0_i32 = arith.constant 0 : i32
    %c0_i32_0 = arith.constant 0 : i32
    %c0_i32_1 = arith.constant 0 : i32
    return %c0_i32, %c0_i32_0 : i32, i32
  }
  func.func @transform_5(%arg0: i32, %arg1: i32) -> (i32, i32, i32) {
    %c0_i32 = arith.constant 0 : i32
    %c0_i32_0 = arith.constant 0 : i32
    return %arg0, %arg1, %c0_i32 : i32, i32, i32
  }
  func.func @transform_6(%arg0: i32, %arg1: i32) -> (i32, i32, i32) {
    %c0_i32 = arith.constant 0 : i32
    %c0_i32_0 = arith.constant 0 : i32
    return %arg0, %arg1, %c0_i32 : i32, i32, i32
  }
}

</mosaic_0001>

<bundles_post_ra>
// kernel: tpu_custom_call.1
= control target key start
LH: loop header
LB: loop body
LE: loop exit
PB: predicated region body
PF: predicated region fallthrough
CT: control target
= control target key end

     0   :  { %12 = vsyncpa [#allocation3], 0  ;;  %s985_s0 = inlined_call_operand.vmem [shape: f32[2,8,32], index: 0, kind: input, shape index: {}]   ;;  %s986_s1 = inlined_call_operand.vmem [shape: bf16[32,16], index: 1, kind: input, shape index: {}]   ;;  %s987_s2 = inlined_call_operand.vmem [shape: f32[1,16], index: 2, kind: input, shape index: {}]   ;;  %s988_s3 = inlined_call_operand.vmem [shape: bf16[32,16], index: 3, kind: input, shape index: {}]   ;;  %s989_s4 = inlined_call_operand.vmem [shape: f32[1,16], index: 4, kind: input, shape index: {}]   ;;  %s990_s5 = inlined_call_operand.hbm [shape: bf16[2,8,16], index: 5, kind: output, shape index: {0}]   ;;  %s991_s6 = inlined_call_operand.hbm [shape: bf16[2,8,16], index: 6, kind: output, shape index: {1}]  }
   0x1   :  { %14 = vsyncpa [#allocation3 + $0x1], 0 }
   0x2   :  { %15 = vsyncpa [#allocation5], 0 }
   0x3   :  { %17 = vsyncpa [#allocation5 + $0x1], 0  ;;  %s822_s21 = smov 0   ;;  %s824_s22 = smov 0  }
   0x4   :  { %s826_s23 = smov 0   ;;  %s828_s24 = smov 0  }
   0x5   :  { %s830_s25 = smov 0   ;;  %s832_s26 = smov 0  }
   0x6 LB: > { %s561_s27 = sadd.s32 4294967295, %s781_s26   ;;  %s562_s28 = sadd.s32 4294967294, %s781_s26   ;;  %s781_s26 = sphi %s832_s26, %s23_s26   ;;  %s777_s25 = sphi %s830_s25, %s998_s25   ;;  %s773_s24 = sphi %s828_s24, %s997_s24   ;;  %s769_s23 = sphi %s826_s23, %s996_s23   ;;  %s765_s22 = sphi %s824_s22, %s995_s22   ;;  %s761_s21 = sphi %s822_s21, %s994_s21  }
   0x7   : > { %s35_s29 = sadd.s32 1, %s777_s25  ;;  %s156_s30 = sadd.s32 1, %s769_s23 }
   0x8   : > { %p37_p0 = scmp.ge.s32.totalorder %s35_s29, 2  ;;  %p166_p1 = scmp.ne.s32.totalorder %s769_s23, %s765_s22 }
   0x9   : > { %p167_p2 = scmp.eq.s32.totalorder %s561_s27, 1  ;;  %p172_p3 = scmp.ne.s32.totalorder %s765_s22, %s761_s21 }
   0xa   : > { %s1000_s29 = smov (%p37_p0, %s35_s29), 0  ;;  %p173_p5 = scmp.eq.s32.totalorder %s562_s28, 1 }
   0xb   : > { %p862_p4 = por %p167_p2, %p166_p1  ;;  %s151_s8 = ssub.s32 %s777_s25, %s1000_s29 }
   0xc   : > { %p565_p6 = scmp.ge.s32.totalorder %s781_s26, 1  ;;  %p154_p7 = scmp.eq.s32.totalorder %s151_s8, 0 }
   0xd   : > { %p869_p8 = por %p173_p5, %p172_p3  ;;  %p241_p9 = scmp.lt.s32.totalorder %s781_s26, 3 }
   0xe   : > { %s875_s10 = scalar_select %p154_p7, %s769_s23, %s156_s30  }
   0xf   : > { %p242_p10 = pnand %p565_p6, %p241_p9 }
  0x10   : > { %v667_v0 = vld [vmem:[%s986_s1] sm:$0xff] (!%p242_p10)   ;;  %v783_v1 = vmov (!%p242_p10), 0.0   ;;  %v669_v3 = vld [vmem:[%s986_s1 + $0x8] sm:$0xff] (!%p242_p10)   ;;  %vm784_vm0 = vmmov (!%p242_p10), 0   ;;  %p278_p11 = scmp.lt.s32.totalorder (!%p242_p10), %s773_s24, 1  ;;  %vm311_vm1 = vcmask (!%p242_p10), 261120  }
  0x11   : > { %245 = sbr.rel (%p242_p10) target bundleno = 284 (0x11c), region = 40  ;;  %589 = vmatprep.subr.bf16.mxu0 (!%p242_p10), %v783_v1  ;;  %597 = vmatprep.subr.bf16.mxu1 (!%p242_p10), %v783_v1  ;;  %v668_v2 = vld [vmem:[%s988_s3] sm:$0xff] (!%p242_p10)   ;;  %v670_v4 = vld [vmem:[%s988_s3 + $0x8] sm:$0xff] (!%p242_p10)   ;;  %s895_s8 = sand.u32 (!%p242_p10), 1, %s765_s22   ;;  %vm419_vm2 = vcmask (!%p242_p10), 125952  }
  0x12   : > { %590 = vmatpush3.bf16.msra.mxu0 (!%p242_p10), %v667_v0  ;;  %593 = vmatprep.mubr.msk.bf16.mxu0 (!%p242_p10), %vm784_vm0, %v783_v1  ;;  %s566_s11 = sshll.u32 (!%p242_p10), %s895_s8, 2  ;;  %v569_v7 = vld [vmem:[%s987_s2] ss:$0 sm:$0xff] (!%p242_p10)  ;;  %s579_s16 = sshll.u32 (!%p242_p10), %s773_s24, 6 }
  0x13   : > { %598 = vmatpush3.bf16.msra.mxu1 (!%p242_p10), %v668_v2  ;;  %591 = vmatprep.subr.bf16.mxu0 (!%p242_p10), %v783_v1  ;;  %v573_v8 = vld [vmem:[%s989_s4] ss:$0 sm:$0xff] (!%p242_p10)  ;;  %s270_s17 = scalar_lea.vmem (!%p242_p10), [#allocation2], %s566_s11  ;;  %s424_s13 = scalar_lea.sflag (!%p242_p10), [#allocation3], %s895_s8 }
  0x14   : > { %599 = vmatprep.subr.bf16.mxu1 (!%p242_p10), %v783_v1  ;;  %601 = vmatprep.mubr.msk.bf16.mxu1 (!%p242_p10), %vm784_vm0, %v783_v1  ;;  %s443_s18 = sshll.u32 (!%p242_p10), %s270_s17, 4  ;;  %s785_s15 = smov (!%p242_p10), [#allocation2]   ;;  %s910_s18 = int_to_ptr.vmem [resolvable:$true] %s443_s18 }
  0x15   : > { %s671_s14 = scalar_lea.vmem (!%p242_p10), %s910_s18, 64  ;;  %s675_s27 = sshll.u32 (!%p242_p10), %s785_s15, 4  ;;  %s676_s27 = int_to_ptr.vmem [resolvable:$false] %s675_s27 }
  0x16   : > { %592 = vmatpush3.bf16.msra.mxu0 (!%p242_p10), %v669_v3  ;;  %p672_p12 = scmp.ne.s32.totalorder (!%p242_p10), %s910_s18, %s671_s14  ;;  %s677_s28 = scalar_lea.vmem (!%p242_p10), %s676_s27, 128 }
  0x17   : > { %600 = vmatpush3.bf16.msra.mxu1 (!%p242_p10), %v670_v4  ;;  %p678_p1 = scmp.lt.s32.totalorder (!%p242_p10), %s910_s18, %s676_s27  ;;  %p679_p2 = scmp.lt.s32.totalorder (!%p242_p10), %s677_s28, %s671_s14 }
  0x18   : > { %s279_s19 = scalar_select %p278_p11, %s773_s24, 1 }
  0x19   : > { %p673_p13 = pnand %p672_p12, %p862_p4  ;;  %p680_p3 = por %p679_p2, %p678_p1 }
  0x1a   : > { %s568_s20 = sshll.u32 %s279_s19, 3  ;;  %s277_s19 = scalar_lea.vmem [#allocation4], %s566_s11 }
  0x1b   : > { %s284_s30 = scalar_lea.vmem %s985_s0, %s568_s20  ;;  %s457_s20 = sshll.u32 %s277_s19, 4  ;;  %s917_s20 = int_to_ptr.vmem [resolvable:$true] %s457_s20 }
  0x1c   : > { %v286_v5 = vld [vmem:[%s284_s30] sm:$0xff]  ;;  %s908_s30 = scalar_lea.hbm %s990_s5, %s579_s16  ;;  %s915_s11 = scalar_lea.hbm %s991_s6, %s579_s16 }
  0x1d   : > { %v287_v6 = vpack.c.bf16 %v286_v5, %v286_v5  ;;  %p674_p0 = pneg %p673_p13 }
  0x1f   : > { %594 = vmatmul.mubr.msk.bf16.vlgmr.msra.gmra.mrb[0].mxu0 %vm311_vm1, %v287_v6  ;;  %602 = vmatmul.mubr.msk.bf16.vlgmr.msra.gmra.mrb[0].mxu1 %vm311_vm1, %v287_v6  ;;  %p681_p5 = pnand %p680_p3, %p674_p0 }
  0xf2   : > { %v349_v9 = vpop.f32.mrb[0].mxu0  ;;  %v412_v10 = vpop.f32.mrb[0].mxu1 }
  0xf3   : > { %v350_v11 = vadd.f32 %v569_v7, %v349_v9  ;;  %v413_v12 = vadd.f32 %v573_v8, %v412_v10  ;;  %v595_v13 = vpop.f32.mrb[1].mxu0  ;;  %v603_v14 = vpop.f32.mrb[1].mxu1 }
  0xf4   : > { %v352_v15 = vpop.f32.mrb[2].mxu0  ;;  %v415_v16 = vpop.f32.mrb[2].mxu1 }
  0xf5   : > { %v418_v17 = vpack.c.bf16 %v350_v11, %v350_v11  ;;  %v421_v18 = vpack.c.bf16 %v413_v12, %v413_v12  ;;  %v596_v19 = vpop.f32.mrb[3].mxu0  ;;  %v604_v20 = vpop.f32.mrb[3].mxu1 }
  0xf7   : > { %420 = vst.msk [vmem:[%s270_s17] sm:$0xf] %vm419_vm2, %v418_v17  ;;  %422 = vst.msk [vmem:[%s277_s19] sm:$0xf] %vm419_vm2, %v421_v18 }
  0xf8   : > { %684 = shalt.err (!%p681_p5)
}
  0xf9   : > { %s685_s16 = scalar_lea.hbm %s908_s30, 64  ;;  %s689_s24 = scalar_lea.hbm %s990_s5, 128 }
  0xfa   : > { %p686_p6 = scmp.ne.s32.totalorder %s908_s30, %s685_s16  ;;  %p690_p10 = scmp.lt.u32.totalorder %s908_s30, %s990_s5 }
  0xfb   : > { %p691_p11 = scmp.lt.u32.totalorder %s689_s24, %s685_s16  ;;  %p693_p13 = scmp.lt.u32.totalorder %s685_s16, %s908_s30 }
  0xfc   : > { %p687_p7 = pnand %p686_p6, %p862_p4 }
  0xfd   : > { %p692_p12 = por %p691_p11, %p690_p10 }
  0xfe   : > { %p688_p9 = pneg %p687_p7 }
  0xff   : > { %p694_p0 = por %p693_p13, %p692_p12 }
 0x101   : > { %p695_p1 = pnand %p694_p0, %p688_p9 }
 0x103   : > { %698 = shalt.err (!%p695_p1)
}
 0x104   : > { %605 = dma.vmem_to_hbm [thread:$0]  (%p862_p4), %s910_s18, 64, %s908_s30, %s424_s13  }
 0x105   : > { %s429_s14 = scalar_lea.sflag [#allocation5], %s895_s8  ;;  %s699_s27 = scalar_lea.vmem %s917_s20, 64 }
 0x106   : > { %p700_p2 = scmp.ne.s32.totalorder %s917_s20, %s699_s27  ;;  %s786_s28 = smov [#allocation4]  }
 0x107   : > { %s703_s16 = sshll.u32 %s786_s28, 4  ;;  %s704_s16 = int_to_ptr.vmem [resolvable:$false] %s703_s16 }
 0x108   : > { %p701_p3 = pnand %p700_p2, %p862_p4  ;;  %s705_s17 = scalar_lea.vmem %s704_s16, 128 }
 0x109   : > { %p706_p6 = scmp.lt.s32.totalorder %s917_s20, %s704_s16  ;;  %p707_p7 = scmp.lt.s32.totalorder %s705_s17, %s699_s27 }
 0x10a   : > { %p702_p5 = pneg %p701_p3 }
 0x10b   : > { %p708_p9 = por %p707_p7, %p706_p6 }
 0x10d   : > { %p709_p10 = pnand %p708_p9, %p702_p5 }
 0x10f   : > { %712 = shalt.err (!%p709_p10)
}
 0x110   : > { %s713_s8 = scalar_lea.hbm %s915_s11, 64  ;;  %s717_s13 = scalar_lea.hbm %s991_s6, 128 }
 0x111   : > { %p714_p11 = scmp.ne.s32.totalorder %s915_s11, %s713_s8  ;;  %p718_p0 = scmp.lt.u32.totalorder %s915_s11, %s991_s6 }
 0x112   : > { %p719_p1 = scmp.lt.u32.totalorder %s717_s13, %s713_s8  ;;  %p721_p3 = scmp.lt.u32.totalorder %s713_s8, %s915_s11 }
 0x113   : > { %p715_p12 = pnand %p714_p11, %p862_p4 }
 0x114   : > { %p720_p2 = por %p719_p1, %p718_p0 }
 0x115   : > { %p716_p13 = pneg %p715_p12 }
 0x116   : > { %p722_p5 = por %p721_p3, %p720_p2 }
 0x118   : > { %p723_p6 = pnand %p722_p5, %p716_p13 }
 0x11a   : > { %726 = shalt.err (!%p723_p6)
}
 0x11b   : > { %606 = dma.vmem_to_hbm [thread:$0]  (%p862_p4), %s917_s20, 64, %s915_s11, %s429_s14  }
 0x11c PF: > { %p616_p7 = scmp.ge.s32.totalorder %s781_s26, 2  ;;  %s469_s12 = sand.u32 1, %s761_s21  }
 0x11d   : > { %s470_s15 = scalar_lea.sflag [#allocation3], %s469_s12 }
 0x11e   : > { %p610_p9 = pnand %p616_p7, %p869_p8 }
 0x120   : > { %752 = dma.done.wait (!%p610_p9), %s470_s15, 64  }
 0x121   : > { %754 = vsyncadd (!%p610_p9), %s470_s15, 4294967232  ;;  %s479_s27 = scalar_lea.sflag [#allocation5], %s469_s12 }
 0x122   : > { %756 = dma.done.wait (!%p610_p9), %s479_s27, 64  }
 0x123   : > { %758 = vsyncadd (!%p610_p9), %s479_s27, 4294967232  ;;  %s23_s26 = sadd.s32 1, %s781_s26   ;;  %s994_s21 = smov %s765_s22 }
 0x124   : > { %p20_p10 = scmp.ge.s32.totalorder %s23_s26, 4   ;;  %s995_s22 = smov %s769_s23 }
 0x125   : > { %s996_s23 = smov %s875_s10  ;;  %s997_s24 = smov %s777_s25 }
 0x126   : > { %s998_s25 = smov %s1000_s29  ;;  %22 = sbr.rel (!%p20_p10) target bundleno = 6 (0x6), region = 92 }
 0x12d   :  { %484 = vsyncpa [#allocation3], 1 }
 0x12e   :  { %486 = vsyncpa [#allocation3 + $0x1], 1 }
 0x12f   :  { %487 = vsyncpa [#allocation5], 1 }
 0x130   :  { %489 = vsyncpa [#allocation5 + $0x1], 1 }

</bundles_post_ra>
